<compile_context>
chip_gen: v5e
topology: v5e:2x2
jax: 0.10.0
libtpu: 0.0.40
codegen_flags: <defaults>
</compile_context>

<pallas_src>
import jax
import jax.numpy as jnp
from jax.experimental import pallas as pl
from jax.experimental.pallas import tpu as pltpu


def _conv2d_matmul_kernel(p_ref, w_ref, b_ref, o_ref):
    # p_ref: (K, NP_pad)      im2col patches, batch*spatial on lanes (mult. of 128)
    # w_ref: (C_out, K)       flattened conv weights
    # b_ref: (C_out, 1)       bias column
    # o_ref: (C_out, NP_pad)
    acc = jnp.dot(w_ref[...], p_ref[...], preferred_element_type=jnp.float32)
    o_ref[...] = (acc + b_ref[...].astype(jnp.float32)).astype(o_ref.dtype)


def conv2d_pallas(x_nchw, w_oihw, bias):
    """nn.Conv2d(3, 6, 3, stride=1, padding=0) forward. NCHW in/out like PyTorch."""
    N, C_in, H, W = x_nchw.shape
    C_out, C_in_w, KH, KW = w_oihw.shape
    assert C_in == C_in_w
    H_out, W_out = H - KH + 1, W - KW + 1
    P = H_out * W_out                     # 196
    K = C_in * KH * KW                    # 27
    NP = N * P                            # 392
    NP_pad = ((NP + 127) // 128) * 128    # 512  (lane-dense output)

    # --- wrapper-side layout glue (no compute) -------------------------------
    # im2col: taps ordered (cin, kh, kw) to match w.reshape(C_out, Cin*KH*KW).
    taps = [x_nchw[:, :, kh:kh + H_out, kw:kw + W_out]        # (N, Cin, Ho, Wo)
            for kh in range(KH) for kw in range(KW)]
    patches = jnp.stack(taps, axis=2).reshape(N, K, P)        # (N, 27, 196)
    patches = patches.transpose(1, 0, 2).reshape(K, NP)       # (27, N*196)
    patches = jnp.pad(patches, ((0, 0), (0, NP_pad - NP)))    # (27, 512)
    w_flat = w_oihw.reshape(C_out, K)                         # (6, 27)
    b_col = bias.reshape(C_out, 1)                            # (6, 1)

    out = pl.pallas_call(
        _conv2d_matmul_kernel,
        out_shape=jax.ShapeDtypeStruct((C_out, NP_pad), x_nchw.dtype),
        grid=(1,),
        in_specs=[
            pl.BlockSpec((K, NP_pad), lambda i: (0, 0)),
            pl.BlockSpec((C_out, K), lambda i: (0, 0)),
            pl.BlockSpec((C_out, 1), lambda i: (0, 0)),
        ],
        out_specs=pl.BlockSpec((C_out, NP_pad), lambda i: (0, 0)),
        compiler_params=pltpu.CompilerParams(
            dimension_semantics=("arbitrary",),
            # Tiny problem; explicit limit is just a guard for v7x's 64 MiB VMEM
            # if shapes ever scale.
            vmem_limit_bytes=32 * 1024 * 1024,
        ),
    )(patches, w_flat, b_col)

    # (C_out, N*P) -> slice off lane padding -> back to PyTorch NCHW.
    out = out[:, :NP].reshape(C_out, N, P).transpose(1, 0, 2)
    return out.reshape(N, C_out, H_out, W_out)


if __name__ == "__main__":
    key = jax.random.PRNGKey(0)
    k_x, k_w, k_b = jax.random.split(key, 3)

    N, C_in, H, W = 2, 3, 16, 16
    C_out, KH, KW = 6, 3, 3

    # Deterministic init (mimicking PyTorch's U(-1/sqrt(fan_in), +1/sqrt(fan_in))).
    fan_in = C_in * KH * KW
    bound = 1.0 / jnp.sqrt(jnp.float32(fan_in))
    x = jax.random.normal(k_x, (N, C_in, H, W), dtype=jnp.float32)
    w = jax.random.uniform(k_w, (C_out, C_in, KH, KW), minval=-bound, maxval=bound,
                           dtype=jnp.float32)
    b = jax.random.uniform(k_b, (C_out,), minval=-bound, maxval=bound,
                           dtype=jnp.float32)

    out = conv2d_pallas(x, w, b)
    out = jax.block_until_ready(out)

    # Cross-check against XLA's conv (same semantics as nn.Conv2d, NCHW/OIHW).
    ref = jax.lax.conv_general_dilated(
        x, w, window_strides=(1, 1), padding="VALID",
        dimension_numbers=("NCHW", "OIHW", "NCHW"),
    ) + b.reshape(1, C_out, 1, 1)
    assert out.shape == (N, C_out, H - 2, W - 2)
    assert jnp.allclose(out, ref, atol=1e-5, rtol=1e-5)

    print("KERNEL_OK")
</pallas_src>

<mosaic_0001>
module attributes {stable_mosaic.version = 11 : i64} {
  func.func @_conv2d_matmul_kernel(%arg0: i32, %arg1: memref<27x512xf32, #tpu.memory_space<vmem>>, %arg2: memref<6x27xf32, #tpu.memory_space<vmem>>, %arg3: memref<6x1xf32, #tpu.memory_space<vmem>>, %arg4: memref<6x512xf32, #tpu.memory_space<vmem>>) attributes {dimension_semantics = [#tpu.dimension_semantics<arbitrary>], iteration_bounds = array<i64: 1>, scalar_prefetch = 0 : i64, scratch_operands = 0 : i64, tpu.core_type = #tpu.core_type<tc>, window_params = [{pipeline_mode = #tpu.pipeline_mode<synchronous>, transform_indices = @transform_0, window_bounds = array<i64: 27, 512>}, {pipeline_mode = #tpu.pipeline_mode<synchronous>, transform_indices = @transform_1, window_bounds = array<i64: 6, 27>}, {pipeline_mode = #tpu.pipeline_mode<synchronous>, transform_indices = @transform_2, window_bounds = array<i64: 6, 1>}, {pipeline_mode = #tpu.pipeline_mode<synchronous>, transform_indices = @transform_3, window_bounds = array<i64: 6, 512>}]} {
    %c0 = arith.constant 0 : index
    %c0_0 = arith.constant 0 : index
    %0 = vector.load %arg2[%c0, %c0_0] : memref<6x27xf32, #tpu.memory_space<vmem>>, vector<6x27xf32>
    %c0_1 = arith.constant 0 : index
    %c0_2 = arith.constant 0 : index
    %1 = vector.load %arg1[%c0_1, %c0_2] : memref<27x512xf32, #tpu.memory_space<vmem>>, vector<27x512xf32>
    %cst = arith.constant dense<0.000000e+00> : vector<6x512xf32>
    %2 = tpu.matmul %0, %1, %cst {dimension_numbers = #tpu.dot_dimension_numbers<[1], [0], [0], [1], [0, 0, 1, 1], [], []>} : vector<6x27xf32>, vector<27x512xf32>, vector<6x512xf32> -> vector<6x512xf32>
    %c0_3 = arith.constant 0 : index
    %c0_4 = arith.constant 0 : index
    %3 = vector.load %arg3[%c0_3, %c0_4] : memref<6x1xf32, #tpu.memory_space<vmem>>, vector<6x1xf32>
    %4 = vector.broadcast %3 : vector<6x1xf32> to vector<6x512xf32>
    %5 = arith.addf %2, %4 : vector<6x512xf32>
    %c0_5 = arith.constant 0 : index
    %c0_6 = arith.constant 0 : index
    %6 = vector.load %arg4[%c0_5, %c0_6] : memref<6x512xf32, #tpu.memory_space<vmem>>, vector<6x512xf32>
    tpu.vector_store %arg4[%c0_5, %c0_6], %5 {strides = array<i32>} : memref<6x512xf32, #tpu.memory_space<vmem>>, vector<6x512xf32>,
    return
  }
  func.func @transform_0(%arg0: i32) -> (i32, i32) {
    %c0_i32 = arith.constant 0 : i32
    %c0_i32_0 = arith.constant 0 : i32
    %c0_i32_1 = arith.constant 0 : i32
    return %c0_i32, %c0_i32_0 : i32, i32
  }
  func.func @transform_1(%arg0: i32) -> (i32, i32) {
    %c0_i32 = arith.constant 0 : i32
    %c0_i32_0 = arith.constant 0 : i32
    %c0_i32_1 = arith.constant 0 : i32
    return %c0_i32, %c0_i32_0 : i32, i32
  }
  func.func @transform_2(%arg0: i32) -> (i32, i32) {
    %c0_i32 = arith.constant 0 : i32
    %c0_i32_0 = arith.constant 0 : i32
    %c0_i32_1 = arith.constant 0 : i32
    return %c0_i32, %c0_i32_0 : i32, i32
  }
  func.func @transform_3(%arg0: i32) -> (i32, i32) {
    %c0_i32 = arith.constant 0 : i32
    %c0_i32_0 = arith.constant 0 : i32
    %c0_i32_1 = arith.constant 0 : i32
    return %c0_i32, %c0_i32_0 : i32, i32
  }
}

</mosaic_0001>

<bundles_post_ra>
// kernel: tpu_custom_call.1
= control target key start
LH: loop header
LB: loop body
LE: loop exit
PB: predicated region body
PF: predicated region fallthrough
CT: control target
= control target key end

     0   :  { %8 = vsyncpa [#allocation3], 0  ;;  %s279_s0 = inlined_call_operand.hbm [shape: f32[27,512], index: 0, kind: input, shape index: {}]   ;;  %s280_s1 = inlined_call_operand.vmem [shape: f32[6,27], index: 1, kind: input, shape index: {}]   ;;  %s281_s2 = inlined_call_operand.vmem [shape: f32[6,1], index: 2, kind: input, shape index: {}]   ;;  %s282_s3 = inlined_call_operand.hbm [shape: f32[6,512], index: 3, kind: output, shape index: {}]  }
   0x1   :  { %9 = vsyncpa [#allocation4], 0  ;;  %s14_s14 = sshll.u32 %s279_s0, 4  ;;  %s238_s15 = smov [#allocation2]   ;;  %s15_s14 = int_to_ptr.hbm [resolvable:$true] %s14_s14 }
   0x2   :  { %s16_s16 = sshll.u32 %s238_s15, 4  ;;  %s239_s17 = smov 512   ;;  %s17_s16 = int_to_ptr.vmem [resolvable:$true] %s16_s16 }
   0x3   :  { %s240_s18 = smov 32  }
   0x4   :  { %22 = dma.hbm_to_vmem [thread:$0]  %s15_s14, 2048, %s17_s16, [#allocation3], %s239_s17, %s239_s17, %s240_s18  }
   0x5   :  { %234 = dma.done.wait [#allocation3], 2048  }
   0x6   :  { %235 = vsyncadd [#allocation3], 4294965248  ;;  %v241_v0 = vmov 0   ;;  %vm58_vm0 = vcmask 1042432   ;;  %v46_v1 = vld [vmem:[#allocation2 + $0x70] sm:$0x7] }
   0x7   :  { %185 = vset.pattern.permute.xlu0 %v241_v0  ;;  %v47_v2 = vld [vmem:[#allocation2 + $0x78] sm:$0x7]  ;;  %v42_v3 = vld [vmem:[#allocation2 + $0x50] sm:$0xff]  ;;  %176 = vmatpush.msk.msra.mxu2 %vm58_vm0, %v46_v1  ;;  %v44_v7 = vld [vmem:[#allocation2 + $0x60] sm:$0x7]  ;;  %vm54_vm1 = vcmask 220160  }
   0x8   :  { %178 = vmatpush.msk.msra.mxu3 %vm58_vm0, %v47_v2  ;;  %v43_v4 = vld [vmem:[#allocation2 + $0x58] sm:$0xff]  ;;  %v38_v5 = vld [vmem:[#allocation2 + $0x30] sm:$0xff]  ;;  %v45_v8 = vld [vmem:[#allocation2 + $0x68] sm:$0x7]  ;;  %172 = vmatpush.msk.msra.mxu0 %vm58_vm0, %v44_v7  ;;  %s162_s24 = sshll.u32 %s282_s3, 4  ;;  %s163_s24 = int_to_ptr.hbm [resolvable:$true] %s162_s24 }
   0x9   :  { %v39_v6 = vld [vmem:[#allocation2 + $0x38] sm:$0xff]  ;;  %124 = vmatpush.msra.mxu2 %v42_v3  ;;  %v40_v9 = vld [vmem:[#allocation2 + $0x40] sm:$0xff]  ;;  %174 = vmatpush.msk.msra.mxu1 %vm58_vm0, %v45_v8  ;;  %v34_v10 = vld [vmem:[#allocation2 + $0x10] sm:$0xff] }
   0xa   :  { %144 = vmatpush.msra.mxu3 %v43_v4  ;;  %v35_v11 = vld [vmem:[#allocation2 + $0x18] sm:$0xff]  ;;  %v41_v12 = vld [vmem:[#allocation2 + $0x48] sm:$0xff]  ;;  %v31_v13 = vld [vmem:[%s280_s1] sm:$0x3f]  ;;  %84 = vmatpush.msra.mxu0 %v40_v9  ;;  %s242_s1 = smov [#allocation5]  }
   0xb   :  { %125 = vmatpush.msra.mxu2 %v38_v5  ;;  %104 = vmatpush.msra.mxu1 %v41_v12  ;;  %v36_v14 = vld [vmem:[#allocation2 + $0x20] sm:$0xff]  ;;  %v37_v15 = vld [vmem:[#allocation2 + $0x28] sm:$0xff] }
   0xc   :  { %145 = vmatpush.msra.mxu3 %v39_v6  ;;  %v48_v16 = vld [vmem:[%s281_s2] sm:$0x3f]  ;;  %v33_v18 = vld [vmem:[#allocation2 + $0x8] sm:$0xff]  ;;  %85 = vmatpush.msra.mxu0 %v36_v14  ;;  %s160_s2 = sshll.u32 %s242_s1, 4  ;;  %s161_s2 = int_to_ptr.vmem [resolvable:$true] %s160_s2 }
   0xd   :  { %126 = vmatpush.msra.mxu2 %v34_v10  ;;  %v32_v17 = vld [vmem:[#allocation2] sm:$0xff]  ;;  %105 = vmatpush.msra.mxu1 %v37_v15 }
   0xe   :  { %146 = vmatpush.msra.mxu3 %v35_v11  ;;  %177 = vmatmul.msk.f32.vlgmr.msra.gmra.mxu2 %vm54_vm1, %v31_v13 }
   0xf   :  { %179 = vmatmul.msk.f32.vlgmr.msra.gmra.mxu3 %vm54_vm1, %v31_v13  ;;  %51 = vperm.xlu0 %185, %v48_v16  }
  0x10   :  { %86 = vmatpush.msra.mxu0 %v32_v17  ;;  %106 = vmatpush.msra.mxu1 %v33_v18 }
  0x11   :  { %173 = vmatmul.msk.f32.vlgmr.msra.gmra.mxu0 %vm54_vm1, %v31_v13  ;;  %175 = vmatmul.msk.f32.vlgmr.msra.gmra.mxu1 %vm54_vm1, %v31_v13 }
  0x81   :  { %v52_v19 = vpop.permute.xlu0 %51 }
  0x8e   :  { %v88_v20 = vpop.f32.mrf.mxu0  ;;  %v108_v21 = vpop.f32.mrf.mxu1 }
  0x8f   :  { %v89_v22 = vadd.f32 %v88_v20, %v52_v19  ;;  %v109_v23 = vadd.f32 %v108_v21, %v52_v19 }
  0x91   :  { %v128_v24 = vpop.f32.mrf.mxu2  ;;  %151 = vst [vmem:[#allocation5] sm:$0x3f] %v89_v22 }
  0x92   :  { %v148_v25 = vpop.f32.mrf.mxu3  ;;  %v129_v26 = vadd.f32 %v128_v24, %v52_v19  ;;  %152 = vst [vmem:[#allocation5 + $0x8] sm:$0x3f] %v109_v23 }
  0x93   :  { %v149_v27 = vadd.f32 %v148_v25, %v52_v19 }
  0x94   :  { %153 = vst [vmem:[#allocation5 + $0x10] sm:$0x3f] %v129_v26 }
  0x95   :  { %154 = vst [vmem:[#allocation5 + $0x18] sm:$0x3f] %v149_v27 }
  0x96   :  { %165 = dma.vmem_to_hbm [thread:$0]  %s161_s2, 512, %s163_s24, [#allocation4]  }
  0x97   :  { %236 = dma.done.wait [#allocation4], 512  }
  0x98   :  { %237 = vsyncadd [#allocation4], 4294966784 }
  0x99   :  { %170 = vsyncpa [#allocation3], 1 }
  0x9a   :  { %171 = vsyncpa [#allocation4], 1 }

</bundles_post_ra>
